<compile_context>
chip_gen: v7x
topology: tpu7x:2x2x1
jax: 0.10.0
libtpu: 0.0.40
codegen_flags: <defaults>
</compile_context>

<pallas_src>
import numpy as np
import jax
import jax.numpy as jnp
from jax.experimental import pallas as pl
from jax.experimental.pallas import tpu as pltpu

CODES = {"A": 0, "C": 1, "G": 2, "T": 3, "N": 4}
LETTERS = "ACGTN"

# Vectorized char -> id lookup table (upper and lower case); unknown chars map to
# 'N' (id 4), which encodes to an all-zero column.
_LUT = np.full(256, 4, dtype=np.uint8)
for _ch, _v in CODES.items():
    _LUT[ord(_ch)] = _v
    _LUT[ord(_ch.lower())] = _v


def n2id(n: str) -> int:
    return CODES[n.upper()]


# Max tile along L: multiple of 128. Output block = 4 * TILE_L * 4 B = 2 MiB.
_TILE_L_MAX = 128 * 1024


def _seq2tensor_kernel(ids_ref, out_ref):
    # ids_ref: (1, TILE_L) int8   out_ref: (4, TILE_L) float32
    ids = ids_ref[...].astype(jnp.int32)                          # (1, TILE_L)
    ch = jax.lax.broadcasted_iota(jnp.int32, out_ref.shape, 0)    # (4, TILE_L), 0..3
    # Channel iota spans only 0..3, so id==4 ('N') never matches -> all-zero column,
    # reproducing the "one-hot encode N with 0 0 0 0" behaviour. Implicit broadcast
    # of (1, T) against (4, T) avoids materializing an extra int32 tile.
    out_ref[...] = (ch == ids).astype(jnp.float32)


def bhi_seq2tensor(seq: str) -> jax.Array:
    """Pallas implementation of BHI_Seq2Tensor.forward. Returns (4, len(seq)) f32."""
    # Host-side: vectorized char -> id (no per-character Python loop).
    ids_np = _LUT[np.frombuffer(seq.encode("ascii"), dtype=np.uint8)]
    L = int(ids_np.shape[0])

    # Pick a 128-aligned tile; pad L up to a multiple of it using id=4 ('N') so every
    # tile is full (unmasked lane-dense stores) and padded columns are all zeros.
    tile_l = min(_TILE_L_MAX, ((L + 127) // 128) * 128)
    L_pad = ((L + tile_l - 1) // tile_l) * tile_l
    if L_pad != L:
        ids_np = np.concatenate(
            [ids_np, np.full(L_pad - L, 4, dtype=np.uint8)])
    ids = jnp.asarray(ids_np.astype(np.int8).reshape(1, L_pad))

    out = pl.pallas_call(
        _seq2tensor_kernel,
        out_shape=jax.ShapeDtypeStruct((4, L_pad), jnp.float32),
        grid=(L_pad // tile_l,),
        in_specs=[pl.BlockSpec((1, tile_l), lambda i: (0, i))],
        out_specs=pl.BlockSpec((4, tile_l), lambda i: (0, i)),
        compiler_params=pltpu.CompilerParams(
            dimension_semantics=("parallel",)),
    )(ids)
    return out[:, :L]


def _reference(seq: str) -> np.ndarray:
    # Pure-numpy mirror of the PyTorch forward, for verification.
    ids = np.array([n2id(x) for x in seq])
    code = np.eye(5, dtype=np.int64)[ids]
    code[code[:, 4] == 1] = 0
    code = code[:, :4].astype(np.float32)
    return code.T


if __name__ == "__main__":
    key = jax.random.PRNGKey(0)

    # Small deterministic example (L=16), exercises the pad-to-128 + slice path.
    L = 16
    rand_ids = jax.random.randint(key, (L,), minval=0, maxval=5)
    seq = "".join(LETTERS[int(i)] for i in np.asarray(rand_ids))

    out = bhi_seq2tensor(seq)
    out = jax.block_until_ready(out)
    np.testing.assert_allclose(np.asarray(out), _reference(seq), rtol=0, atol=0)
    assert out.shape == (4, L) and out.dtype == jnp.float32

    # A second, non-128-multiple length to check padding/slicing correctness.
    L2 = 300
    rand_ids2 = jax.random.randint(jax.random.PRNGKey(1), (L2,), minval=0, maxval=5)
    seq2 = "".join(LETTERS[int(i)] for i in np.asarray(rand_ids2))
    out2 = jax.block_until_ready(bhi_seq2tensor(seq2))
    np.testing.assert_allclose(np.asarray(out2), _reference(seq2), rtol=0, atol=0)
    assert out2.shape == (4, L2) and out2.dtype == jnp.float32

    print("KERNEL_OK")
</pallas_src>

<mosaic_0001>
module attributes {stable_mosaic.version = 11 : i64} {
  func.func @_seq2tensor_kernel(%arg0: i32, %arg1: memref<1x128xi8, #tpu.memory_space<vmem>>, %arg2: memref<4x128xf32, #tpu.memory_space<vmem>>) attributes {dimension_semantics = [#tpu.dimension_semantics<parallel>], iteration_bounds = array<i64: 1>, scalar_prefetch = 0 : i64, scratch_operands = 0 : i64, tpu.core_type = #tpu.core_type<tc>, window_params = [{transform_indices = @transform_0, window_bounds = array<i64: 1, 128>}, {transform_indices = @transform_1, window_bounds = array<i64: 4, 128>}]} {
    %c0 = arith.constant 0 : index
    %c0_0 = arith.constant 0 : index
    %0 = vector.load %arg1[%c0, %c0_0] : memref<1x128xi8, #tpu.memory_space<vmem>>, vector<1x128xi8>
    %1 = arith.extsi %0 : vector<1x128xi8> to vector<1x128xi32>
    %2 = tpu.iota {dimensions = array<i32: 0>} : vector<4x128xi32>
    %3 = vector.broadcast %1 : vector<1x128xi32> to vector<4x128xi32>
    %4 = arith.cmpi eq, %2, %3 : vector<4x128xi32>
    %5 = arith.extui %4 : vector<4x128xi1> to vector<4x128xi32>
    %6 = arith.sitofp %5 : vector<4x128xi32> to vector<4x128xf32>
    %c0_1 = arith.constant 0 : index
    %c0_2 = arith.constant 0 : index
    %7 = vector.load %arg2[%c0_1, %c0_2] : memref<4x128xf32, #tpu.memory_space<vmem>>, vector<4x128xf32>
    tpu.vector_store %arg2[%c0_1, %c0_2], %6 {strides = array<i32>} : memref<4x128xf32, #tpu.memory_space<vmem>>, vector<4x128xf32>,
    return
  }
  func.func @transform_0(%arg0: i32) -> (i32, i32) {
    %c0_i32 = arith.constant 0 : i32
    %c0_i32_0 = arith.constant 0 : i32
    return %c0_i32, %arg0 : i32, i32
  }
  func.func @transform_1(%arg0: i32) -> (i32, i32) {
    %c0_i32 = arith.constant 0 : i32
    %c0_i32_0 = arith.constant 0 : i32
    return %c0_i32, %arg0 : i32, i32
  }
}

</mosaic_0001>

<bundles_post_ra>
// kernel: tpu_custom_call.1
= control target key start
LH: loop header
LB: loop body
LE: loop exit
PB: predicated region body
PF: predicated region fallthrough
CT: control target
= control target key end

     0   :  { %6 = vsyncpa [#allocation3], 0  ;;  %s137_s0 = inlined_call_operand.hbm [shape: s8[1,128], index: 0, kind: input, shape index: {}]   ;;  %s138_s1 = inlined_call_operand.hbm [shape: f32[4,128], index: 1, kind: output, shape index: {}]  }
   0x1   :  { %7 = vsyncpa [#allocation4], 0  ;;  %s100_s6 = smov [#allocation2]   ;;  %s52_s10 = scalar_lea.hbm %s137_s0, 16 }
   0x2   :  { %s14_s7 = sshll.u32 %s100_s6, 4  ;;  %p53_p0 = scmp.ne.s32.totalorder %s137_s0, %s52_s10  ;;  %s15_s7 = int_to_ptr.vmem [resolvable:$true] %s14_s7 }
   0x3   :  { %p56_p1 = scmp.lt.u32.totalorder %s52_s10, %s137_s0 }
   0x5   :  { %p58_p2 = pnand %p56_p1, %p53_p0 }
   0x7   :  { %61 = shalt.err (!%p58_p2)
}
   0x8   :  { %s62_s15 = scalar_lea.vmem %s15_s7, 16  ;;  %s66_s16 = scalar_lea.vmem %s15_s7, 32 }
   0x9   :  { %p63_p3 = scmp.ne.s32.totalorder %s15_s7, %s62_s15  ;;  %p67_p4 = scmp.lt.s32.totalorder %s15_s7, %s15_s7 }
   0xa   :  { %p68_p5 = scmp.lt.s32.totalorder %s66_s16, %s62_s15 }
   0xc   :  { %p69_p6 = por %p68_p5, %p67_p4 }
   0xe   :  { %p70_p7 = pnand %p69_p6, %p63_p3 }
  0x10   :  { %73 = shalt.err (!%p70_p7)
}
  0x11   :  { %17 = dma.hbm_to_vmem [thread:$0]  %s137_s0, 16, %s15_s7, [#allocation3]  }
  0x12   :  { %96 = dma.done.wait [#allocation3], 16  }
  0x13   :  { %97 = vsyncadd [#allocation3], 4294967280  ;;  %v23_v0 = vlaneseq  ;;  %v21_v3 = vld [vmem:[#allocation2] sm:$0x1]  ;;  %s101_s19 = smov [#allocation5]   ;;  %v102_v6 = vmov 0.0  }
  0x14   :  { %v22_v4 = vunpack.c.0.s8 %v21_v3  ;;  %s39_s20 = sshll.u32 %s101_s19, 4  ;;  %s40_s20 = int_to_ptr.vmem [resolvable:$true] %s39_s20 }
  0x15   :  { %v24_v1 = vshrl.u32 %v23_v0, 7  ;;  %s74_s21 = scalar_lea.vmem %s40_s20, 64  ;;  %p79_p9 = scmp.lt.s32.totalorder %s40_s20, %s40_s20 }
  0x16   :  { %p75_p8 = scmp.ne.s32.totalorder %s40_s20, %s74_s21  ;;  %p80_p10 = scmp.lt.s32.totalorder %s74_s21, %s74_s21 }
  0x17   :  { %v27_v2 = vsub.s32 0, %v24_v1 }
  0x18   :  { %p81_p11 = por %p80_p10, %p79_p9 }
  0x19   :  { %v28_v5 = vrot.slane %v22_v4, %v27_v2 }
  0x1a   :  { %p82_p12 = pnand %p81_p11, %p75_p8 }
  0x1b   :  { %vm29_vm0 = vcmp.eq.s32.totalorder %v24_v1, %v28_v5 }
  0x1c   :  { %v48_v7 = vsel %vm29_vm0, 1.0, %v102_v6 }
  0x1d   :  { %32 = vst [vmem:[#allocation5] sm:$0xf] %v48_v7 }
  0x1e   :  { %85 = shalt.err (!%p82_p12)
}
  0x1f   :  { %s86_s23 = scalar_lea.hbm %s138_s1, 64 }
  0x20   :  { %p87_p13 = scmp.ne.s32.totalorder %s138_s1, %s86_s23  ;;  %p90_p0 = scmp.lt.u32.totalorder %s86_s23, %s138_s1 }
  0x22   :  { %p92_p1 = pnand %p90_p0, %p87_p13 }
  0x24   :  { %95 = shalt.err (!%p92_p1)
}
  0x25   :  { %42 = dma.vmem_to_hbm [thread:$0]  %s40_s20, 64, %s138_s1, [#allocation4]  }
  0x26   :  { %98 = dma.done.wait [#allocation4], 64  }
  0x27   :  { %99 = vsyncadd [#allocation4], 4294967232 }
  0x28   :  { %46 = vsyncpa [#allocation3], 1 }
  0x29   :  { %47 = vsyncpa [#allocation4], 1 }

</bundles_post_ra>
